<compile_context>
chip_gen: v7x
topology: tpu7x:2x2x1
jax: 0.10.0
libtpu: 0.0.40
codegen_flags: <defaults>
</compile_context>

<pallas_src>
import jax
import jax.numpy as jnp
from jax.experimental import pallas as pl
from jax.experimental.pallas import tpu as pltpu


_SMALL_BATCH_THRESHOLD = 4096   # no-grid (fully VMEM-resident) path up to here
_MAX_BLOCK_M = 4096             # largest batch tile for the gridded path


def bi_input_mlp_kernel(xT_ref, w1_ref, b1_ref, w2_ref, b2_ref, out_ref):
    # Batch-on-lanes layout:
    #   xT_ref:  (task_bits, Bt)   bf16
    #   w1_ref:  (H, task_bits)    bf16      b1_ref: (H, 1)         f32
    #   w2_ref:  (next_size, H)    bf16      b2_ref: (next_size, 1) f32
    #   out_ref: (next_size, Bt)   f32
    # fc1: (H, task_bits) @ (task_bits, Bt) -> (H, Bt), f32 accumulation on MXU.
    h = jnp.dot(w1_ref[...], xT_ref[...],
                preferred_element_type=jnp.float32) + b1_ref[...]
    # LeakyReLU(negative_slope=0.001): single VPU max.
    h = jnp.maximum(h, 0.001 * h)
    # linear_2: (next_size, H) @ (H, Bt) -> (next_size, Bt).
    y = jnp.dot(w2_ref[...], h.astype(w2_ref.dtype),
                preferred_element_type=jnp.float32) + b2_ref[...]
    out_ref[...] = y.astype(out_ref.dtype)


def prepare_params(params, compute_dtype=jnp.bfloat16):
    """One-time parameter prep (off the hot path).

    Input uses the PyTorch Linear convention:
      fc1_w (H, task_bits), fc1_b (H,), lin2_w (next_size, H), lin2_b (next_size,)
    With batch on lanes, the PyTorch (out, in) weight layout is exactly what the
    kernel's dot(W, x^T) wants, so NO transpose is needed; only dtype cast and
    column-vector biases.
    """
    H = params["fc1_w"].shape[0]
    next_size = params["lin2_w"].shape[0]
    return {
        "w1": jnp.asarray(params["fc1_w"], dtype=compute_dtype),            # (H, task_bits)
        "b1": jnp.asarray(params["fc1_b"], jnp.float32).reshape(H, 1),      # (H, 1)
        "w2": jnp.asarray(params["lin2_w"], dtype=compute_dtype),           # (next_size, H)
        "b2": jnp.asarray(params["lin2_b"], jnp.float32).reshape(next_size, 1),
    }


def _round_up(x, m):
    return ((x + m - 1) // m) * m


def _pick_block_m(B):
    # Keep tiles big (amortize ~0.35 us/grid step) but guarantee >=2 grid steps
    # so dimension_semantics=("parallel",) can shard across TCs on v7x megacore.
    return min(_MAX_BLOCK_M, _round_up(pl.cdiv(B, 2), 128))


def _cost_estimate(B, task_bits, H, next_size, act_dtype, out_dtype):
    act_bytes = jnp.dtype(act_dtype).itemsize
    out_bytes = jnp.dtype(out_dtype).itemsize
    flops = 2 * B * (task_bits * H + H * next_size)
    bytes_accessed = (B * task_bits * act_bytes                      # x^T stream
                      + B * next_size * out_bytes                    # out stream
                      + (H * task_bits + next_size * H) * act_bytes  # weights
                      + (H + next_size) * 4)                         # biases (f32)
    return pl.CostEstimate(flops=flops, transcendentals=0,
                           bytes_accessed=bytes_accessed)


def _forward_small(x_t, w1, b1, w2, b2, out_dtype):
    """No grid: whole arrays resident in VMEM, zero pipeline overhead."""
    task_bits, B = x_t.shape
    H = w1.shape[0]
    next_size = w2.shape[0]
    vmem = pltpu.MemorySpace.VMEM
    return pl.pallas_call(
        bi_input_mlp_kernel,
        out_shape=jax.ShapeDtypeStruct((next_size, B), out_dtype),
        in_specs=[pl.BlockSpec(memory_space=vmem)] * 5,
        out_specs=pl.BlockSpec(memory_space=vmem),
        cost_estimate=_cost_estimate(B, task_bits, H, next_size,
                                     x_t.dtype, out_dtype),
    )(x_t, w1, b1, w2, b2)


def _forward_tiled(x_t, w1, b1, w2, b2, out_dtype, block_m):
    """Batch-tiled path for large B: weights resident in VMEM across the grid,
    batch (lane) axis marked parallel so it shards across TensorCores."""
    task_bits, B = x_t.shape
    H = w1.shape[0]
    next_size = w2.shape[0]
    grid = (pl.cdiv(B, block_m),)
    return pl.pallas_call(
        bi_input_mlp_kernel,
        out_shape=jax.ShapeDtypeStruct((next_size, B), out_dtype),
        grid_spec=pl.GridSpec(
            grid=grid,
            in_specs=[
                pl.BlockSpec((task_bits, block_m), lambda i: (0, i)),  # x^T tiles
                pl.BlockSpec((H, task_bits), lambda i: (0, 0)),        # resident
                pl.BlockSpec((H, 1), lambda i: (0, 0)),                # resident
                pl.BlockSpec((next_size, H), lambda i: (0, 0)),        # resident
                pl.BlockSpec((next_size, 1), lambda i: (0, 0)),        # resident
            ],
            out_specs=pl.BlockSpec((next_size, block_m), lambda i: (0, i)),
        ),
        compiler_params=pltpu.CompilerParams(
            dimension_semantics=("parallel",),
        ),
        cost_estimate=_cost_estimate(B, task_bits, H, next_size,
                                     x_t.dtype, out_dtype),
    )(x_t, w1, b1, w2, b2)


@jax.jit
def bi_input_mlp_forward(task, ctrl, prepared):
    """Forward pass of Bi_Input_MLP.  `ctrl` is accepted for API parity but is
    dead code in the reference forward (everything after the first return)."""
    del ctrl
    w1, b1, w2, b2 = prepared["w1"], prepared["b1"], prepared["w2"], prepared["b2"]
    B = task.shape[0]
    out_dtype = jnp.float32
    # Put batch on the lane (last) axis: lane-dense stores + full-width VPU work.
    x_t = task.astype(w1.dtype).T                      # (task_bits, B), bf16
    if B <= _SMALL_BATCH_THRESHOLD:
        # TODO(synk): at these sizes plain XLA (the _reference expression) would
        # fuse the two tiny matmuls and skip the custom-call boundary entirely;
        # kept on the Pallas no-grid path here so the kernel is exercised.
        out_t = _forward_small(x_t, w1, b1, w2, b2, out_dtype)
    else:
        out_t = _forward_tiled(x_t, w1, b1, w2, b2, out_dtype, _pick_block_m(B))
    return out_t.T                                      # (B, next_size), f32


def _reference(task, prepared):
    """Pure-JAX reference with the same bf16 weight/activation numerics."""
    w1, b1 = prepared["w1"], prepared["b1"]
    w2, b2 = prepared["w2"], prepared["b2"]
    x = task.astype(w1.dtype)
    h = jnp.dot(x, w1.T, preferred_element_type=jnp.float32) + b1.reshape(1, -1)
    h = jnp.maximum(h, 0.001 * h)
    return jnp.dot(h.astype(w2.dtype), w2.T,
                   preferred_element_type=jnp.float32) + b2.reshape(1, -1)


if __name__ == "__main__":
    # Module hyperparameters (small, consistent with the constructor signature).
    task_bits = 16
    ctrl_bits = 8
    task_hidden_size = 32
    next_size = 16
    batch = 8

    key = jax.random.PRNGKey(0)
    k1, k2, k3, k4, k5, k6, k7 = jax.random.split(key, 7)

    # Deterministic synthetic parameters, PyTorch Linear convention (out, in).
    params = {
        "fc1_w": jax.random.normal(k1, (task_hidden_size, task_bits), jnp.float32) * 0.1,
        "fc1_b": jax.random.normal(k2, (task_hidden_size,), jnp.float32) * 0.1,
        "lin2_w": jax.random.normal(k3, (next_size, task_hidden_size), jnp.float32) * 0.1,
        "lin2_b": jax.random.normal(k4, (next_size,), jnp.float32) * 0.1,
    }
    # TODO(synk): linear_2_2/linear_2_3/linear_3/linear_4 exist in __init__ but
    # are unreachable in forward (dead code after the return); not instantiated.

    prepared = prepare_params(params)  # one-time cast/reshape, off hot path

    # --- small-batch path (no grid, fully VMEM-resident, lane-major layout) ---
    task = jax.random.normal(k5, (batch, task_bits), jnp.float32)
    ctrl = jax.random.normal(k6, (batch, ctrl_bits), jnp.float32)
    out = jax.block_until_ready(bi_input_mlp_forward(task, ctrl, prepared))
    ref = _reference(task, prepared)
    assert out.shape == (batch, next_size)
    assert jnp.allclose(out, ref, atol=1e-3, rtol=1e-3), "small-batch mismatch"

    # --- batch-tiled path (grid over lanes, weights resident, >=2 parallel steps,
    #     non-multiple batch exercises the masked edge block) ---
    big_batch = 8500
    task_big = jax.random.normal(k7, (big_batch, task_bits), jnp.float32)
    ctrl_big = jnp.zeros((big_batch, ctrl_bits), jnp.float32)
    out_big = jax.block_until_ready(bi_input_mlp_forward(task_big, ctrl_big, prepared))
    ref_big = _reference(task_big, prepared)
    assert out_big.shape == (big_batch, next_size)
    assert jnp.allclose(out_big, ref_big, atol=1e-3, rtol=1e-3), "tiled mismatch"

    print("KERNEL_OK")
</pallas_src>

<mosaic_0001>
module attributes {stable_mosaic.version = 11 : i64} {
  func.func @bi_input_mlp_kernel(%arg0: memref<16x8xbf16, #tpu.memory_space<vmem>>, %arg1: memref<32x16xbf16, #tpu.memory_space<vmem>>, %arg2: memref<32x1xf32, #tpu.memory_space<vmem>>, %arg3: memref<16x32xbf16, #tpu.memory_space<vmem>>, %arg4: memref<16x1xf32, #tpu.memory_space<vmem>>, %arg5: memref<16x8xf32, #tpu.memory_space<vmem>>) attributes {dimension_semantics = [], scalar_prefetch = 0 : i64, scratch_operands = 0 : i64, tpu.core_type = #tpu.core_type<tc>} {
    %c0 = arith.constant 0 : index
    %c0_0 = arith.constant 0 : index
    %0 = vector.load %arg1[%c0, %c0_0] : memref<32x16xbf16, #tpu.memory_space<vmem>>, vector<32x16xbf16>
    %c0_1 = arith.constant 0 : index
    %c0_2 = arith.constant 0 : index
    %1 = vector.load %arg0[%c0_1, %c0_2] : memref<16x8xbf16, #tpu.memory_space<vmem>>, vector<16x8xbf16>
    %cst = arith.constant dense<0.000000e+00> : vector<32x8xf32>
    %2 = tpu.matmul %0, %1, %cst {dimension_numbers = #tpu.dot_dimension_numbers<[1], [0], [0], [1], [0, 0, 1, 1], [], []>} : vector<32x16xbf16>, vector<16x8xbf16>, vector<32x8xf32> -> vector<32x8xf32>
    %c0_3 = arith.constant 0 : index
    %c0_4 = arith.constant 0 : index
    %3 = vector.load %arg2[%c0_3, %c0_4] : memref<32x1xf32, #tpu.memory_space<vmem>>, vector<32x1xf32>
    %4 = vector.broadcast %3 : vector<32x1xf32> to vector<32x8xf32>
    %5 = arith.addf %2, %4 : vector<32x8xf32>
    %cst_5 = arith.constant 1.000000e-03 : f32
    %6 = vector.broadcast %cst_5 : f32 to vector<32x8xf32>
    %7 = arith.mulf %6, %5 : vector<32x8xf32>
    %8 = arith.maximumf %5, %7 : vector<32x8xf32>
    %c0_6 = arith.constant 0 : index
    %c0_7 = arith.constant 0 : index
    %9 = vector.load %arg3[%c0_6, %c0_7] : memref<16x32xbf16, #tpu.memory_space<vmem>>, vector<16x32xbf16>
    %10 = arith.truncf %8 : vector<32x8xf32> to vector<32x8xbf16>
    %cst_8 = arith.constant dense<0.000000e+00> : vector<16x8xf32>
    %11 = tpu.matmul %9, %10, %cst_8 {dimension_numbers = #tpu.dot_dimension_numbers<[1], [0], [0], [1], [0, 0, 1, 1], [], []>} : vector<16x32xbf16>, vector<32x8xbf16>, vector<16x8xf32> -> vector<16x8xf32>
    %c0_9 = arith.constant 0 : index
    %c0_10 = arith.constant 0 : index
    %12 = vector.load %arg4[%c0_9, %c0_10] : memref<16x1xf32, #tpu.memory_space<vmem>>, vector<16x1xf32>
    %13 = vector.broadcast %12 : vector<16x1xf32> to vector<16x8xf32>
    %14 = arith.addf %11, %13 : vector<16x8xf32>
    %c0_11 = arith.constant 0 : index
    %c0_12 = arith.constant 0 : index
    %15 = vector.load %arg5[%c0_11, %c0_12] : memref<16x8xf32, #tpu.memory_space<vmem>>, vector<16x8xf32>
    tpu.vector_store %arg5[%c0_11, %c0_12], %14 {strides = array<i32>} : memref<16x8xf32, #tpu.memory_space<vmem>>, vector<16x8xf32>,
    return
  }
}

</mosaic_0001>

<bundles_post_ra>
// kernel: bi_input_mlp_forward.1
= control target key start
LH: loop header
LB: loop body
LE: loop exit
PB: predicated region body
PF: predicated region fallthrough
CT: control target
= control target key end

     0   :  { %vm67_vm0 = vcmask 130048   ;;  %v240_v1 = vmov 0   ;;  %v241_v10 = vmov 0.0   ;;  %vm242_vm1 = vmmov 0   ;;  %s311_s0 = inlined_call_operand.vmem [shape: bf16[16,8], index: 0, kind: input, shape index: {}]   ;;  %s312_s1 = inlined_call_operand.vmem [shape: bf16[32,16], index: 1, kind: input, shape index: {}]   ;;  %s313_s2 = inlined_call_operand.vmem [shape: f32[32,1], index: 2, kind: input, shape index: {}]   ;;  %s314_s4 = inlined_call_operand.vmem [shape: f32[16,1], index: 4, kind: input, shape index: {}]   ;;  %s315_s3 = inlined_call_operand.vmem [shape: bf16[16,32], index: 3, kind: input, shape index: {}]   ;;  %s316_s5 = inlined_call_operand.vmem [shape: f32[16,8], index: 5, kind: output, shape index: {}]  }
   0x1   :  { %v236_v0 = vld [vmem:[%s311_s0] sm:$0xff]   ;;  %234 = vset.pattern.permute.xlu0 %v240_v1  ;;  %235 = vset.pattern.permute.xlu1 %v240_v1  ;;  %v238_v3 = vld [vmem:[%s312_s1 + $0x8] sm:$0xff]   ;;  %v29_v5 = vld [vmem:[%s313_s2 + $0x10] sm:$0xff]  ;;  %vm152_vm2 = vcmask 261120   ;;  %vm197_vm3 = vcmask 64512  }
   0x2   :  { %v237_v2 = vld [vmem:[%s312_s1] sm:$0xff]   ;;  %217 = vmatprep.subr.bf16.mxu0 %v236_v0  ;;  %43 = vperm.xlu1 %235, %v29_v5   ;;  %v28_v6 = vld [vmem:[%s313_s2 + $0x8] sm:$0xff]  ;;  %v30_v7 = vld [vmem:[%s313_s2 + $0x18] sm:$0xff] }
   0x3   :  { %218 = vmatpush3.bf16.msra.mxu0 %v236_v0  ;;  %219 = vmatprep.mubr.msk.bf16.mxu0 %vm67_vm0, %v237_v2  ;;  %v27_v4 = vld [vmem:[%s313_s2] sm:$0xff]  ;;  %v136_v9 = vld [vmem:[%s314_s4 + $0x8] sm:$0xff] }
   0x4   :  { %33 = vperm.xlu0 %234, %v27_v4   ;;  %v135_v8 = vld [vmem:[%s314_s4] sm:$0xff]  ;;  %223 = vmatprep.subr.bf16.mxu1 %v241_v10 }
   0x5   :  { %227 = vmatprep.mubr.msk.bf16.mxu1 %vm242_vm1, %v241_v10  ;;  %v239_v33 = vld [vmem:[%s315_s3] sm:$0xff]  }
   0x6   :  { %220 = vmatmul.mubr.msk.bf16.vlgmr.msra.gmra.mrb[0].mxu0 %vm67_vm0, %v238_v3  ;;  %48 = vperm.xlu1 %235, %v30_v7  }
   0x8   :  { %38 = vperm.xlu0 %234, %v28_v6  }
   0xa   :  { %144 = vperm.xlu1 %235, %v136_v9  }
   0xc   :  { %139 = vperm.xlu0 %234, %v135_v8  }
  0x81   :  { %v44_v11 = vpop.permute.xlu1 %43 }
  0x83   :  { %v34_v12 = vpop.permute.xlu0 %33 }
  0x85   :  { %v49_v16 = vpop.permute.xlu1 %48 }
  0x87   :  { %v39_v19 = vpop.permute.xlu0 %38 }
  0x89   :  { %v145_v38 = vpop.permute.xlu1 %144 }
  0x8b   :  { %v140_v34 = vpop.permute.xlu0 %139 }
  0xd9   :  { %v221_v13 = vpop.f32.mrb[0].mxu0 }
  0xda   :  { %v117_v14 = vadd.f32 %v221_v13, %v44_v11  ;;  %v108_v15 = vpop.f32.mrb[1].mxu0 }
  0xdb   :  { %v109_v17 = vadd.f32 %v108_v15, %v34_v12  ;;  %v222_v18 = vpop.f32.mrb[2].mxu0 }
  0xdc   :  { %v125_v20 = vmul.f32 0.001, %v117_v14  ;;  %v120_v21 = vadd.f32 %v222_v18, %v49_v16  ;;  %v111_v22 = vpop.f32.mrb[3].mxu0 }
  0xdd   :  { %v123_v23 = vmul.f32 0.001, %v109_v17  ;;  %v112_v24 = vadd.f32 %v111_v22, %v39_v19 }
  0xde   :  { %v126_v25 = vmul.f32 0.001, %v120_v21  ;;  %v129_v27 = vmax.f32 %v117_v14, %v125_v20 }
  0xdf   :  { %v124_v26 = vmul.f32 0.001, %v112_v24  ;;  %v127_v29 = vmax.f32 %v109_v17, %v123_v23 }
  0xe0   :  { %v130_v28 = vmax.f32 %v120_v21, %v126_v25 }
  0xe1   :  { %v128_v30 = vmax.f32 %v112_v24, %v124_v26 }
  0xe2   :  { %v134_v31 = vpack.c.bf16 %v130_v28, %v129_v27 }
  0xe3   :  { %v133_v32 = vpack.c.bf16 %v128_v30, %v127_v29 }
  0xe5   :  { %224 = vmatpush3.bf16.msra.mxu1 %v133_v32 }
  0xe6   :  { %225 = vmatprep.subr.bf16.mxu1 %v241_v10 }
  0xe9   :  { %226 = vmatpush3.bf16.msra.mxu1 %v134_v31 }
  0xec   :  { %228 = vmatmul.mubr.msk.bf16.vlgmr.msra.gmra.mrb[0].mxu1 %vm152_vm2, %v239_v33 }
 0x1bf   :  { %v190_v35 = vpop.f32.mrb[0].mxu1 }
 0x1c0   :  { %v191_v36 = vadd.f32 %v190_v35, %v140_v34  ;;  %v229_v37 = vpop.f32.mrb[1].mxu1 }
 0x1c1   :  { %v193_v39 = vpop.f32.mrb[2].mxu1 }
 0x1c2   :  { %198 = vst.msk [vmem:[%s316_s5] sm:$0xff] %vm197_vm3, %v191_v36  ;;  %v194_v40 = vadd.f32 %v193_v39, %v145_v38  ;;  %v230_v41 = vpop.f32.mrb[3].mxu1 }
 0x1c4   :  { %199 = vst.msk [vmem:[%s316_s5 + $0x8] sm:$0xff] %vm197_vm3, %v194_v40 }

</bundles_post_ra>
